<compile_context>
chip_gen: v5e
topology: v5e:2x2
jax: 0.10.0
libtpu: 0.0.40
codegen_flags: <defaults>
</compile_context>

<pallas_src>
import functools

import jax
import jax.numpy as jnp
from jax.experimental import pallas as pl
from jax.experimental.pallas import tpu as pltpu

# ----------------------------- constants ------------------------------------
CUTOFF = 10.0
# ElectrostaticEnergy(cuton=0.25*cutoff, cutoff=0.75*cutoff, lr_cutoff=cutoff)
KE = 14.399645351950548
KEHALF = KE / 2.0
CUTON = 0.25 * CUTOFF
SW_CUTOFF = 0.75 * CUTOFF
LR_CUTOFF = CUTOFF
LR2 = LR_CUTOFF ** 2
TWO_DIV_CUT = 2.0 / LR_CUTOFF
RCUTCONSTANT = LR_CUTOFF / (LR_CUTOFF ** 2 + 1.0) ** 1.5
CUTCONSTANT = (2.0 * LR_CUTOFF ** 2 + 1.0) / (LR_CUTOFF ** 2 + 1.0) ** 1.5
# D4-style dispersion constants (Becke-Johnson damping + charge zeta scaling)
S6, S8, A1, A2 = 1.0, 1.2, 0.4, 4.5
GA, GC = 3.0, 2.0

# Deterministic synthetic per-element parameter tables (no checkpoint loading).
ZMAX = 87
_z = jnp.arange(ZMAX + 1, dtype=jnp.float32)
C6_TABLE = jnp.where(_z > 0, 2.0 + 0.1 * _z, 0.0)      # reference C6 per element
R4R2_TABLE = 1.5 + 0.02 * _z                            # sqrt(<r4>/<r2>) per element
ZEFF_TABLE = jnp.maximum(_z, 1.0)                       # effective nuclear charge


# ------------------------------- kernel -------------------------------------
def physnet_energy_kernel(pair_ref, atom_ref, out_ref, stack_ref, *, num_mol_pad):
    c = pl.program_id(0)          # shard: parallel across TensorCores on v7x
    p = pl.program_id(1)          # pair tile within this shard (reduction axis)
    N = atom_ref.shape[1]
    TP = pair_ref.shape[1]
    B = num_mol_pad

    # ---- per-atom preprocessing: once per shard, cached in bf16 scratch ----
    @pl.when(p == 0)
    def _():
        charge = atom_ref[0:1, :]                       # (1, N)
        energy = atom_ref[2:3, :]
        idx_m = atom_ref[3:4, :].astype(jnp.int32)      # molecule index per atom
        c6_a = atom_ref[4:5, :]
        r4r2_a = atom_ref[5:6, :]
        zeff_a = atom_ref[6:7, :]

        # charge redistribution: per-molecule charge sum + atom count via one
        # MXU contraction over atoms (one-hot molecule mask), gathered back.
        mol_iota = jax.lax.broadcasted_iota(jnp.int32, (B, N), 0)
        M = (mol_iota == idx_m).astype(jnp.float32)                      # (B, N)
        cv = atom_ref[0:2, :]                                            # [charge; valid]
        dn_n = (((1,), (1,)), ((), ()))                                  # contract atom axis
        mol_sums = jax.lax.dot_general(cv, M, dn_n,
                                       preferred_element_type=jnp.float32)  # (2, B)
        back = jnp.dot(mol_sums, M, preferred_element_type=jnp.float32)     # (2, N)
        q_mol_atom = back[0:1, :]            # sum of charges of this atom's molecule
        cnt_atom = back[1:2, :]              # number of atoms in this atom's molecule
        w = 1.0 / jnp.maximum(cnt_atom, 1.0)
        qa = charge - q_mol_atom * w         # corrected partial charges (mol charge -> 0)

        # ---- charge scaling (simplified D4 zeta) ----
        zq = zeff_a + qa
        zq_safe = jnp.where(zq > 0.0, zq, 1.0)
        zeta = jnp.where(zq > 0.0,
                         jnp.exp(GA * (1.0 - jnp.exp(GC * (1.0 - zeff_a / zq_safe)))),
                         jnp.exp(GA))
        c6_eff = c6_a * zeta * zeta

        # stacked per-atom operand for the pair path, converted to bf16 ONCE
        pad_rows = jnp.zeros((5, N), jnp.float32)
        stacked = jnp.concatenate([qa, c6_eff, r4r2_a, pad_rows], axis=0)   # (8, N)
        stack_ref[...] = stacked.astype(jnp.bfloat16)

        # accumulator init; per-atom network energy only on shard 0 so the
        # wrapper-side sum over shards does not double count it.
        init = energy * (c == 0).astype(jnp.float32)
        out_ref[...] = init.reshape(out_ref.shape)

    # NOTE: cutoff_fn(d_ij) is computed in the PyTorch reference but its result
    # is never used; the dead computation is intentionally omitted here.

    # ------------------------------ per pair tile ----------------------------
    rij = pair_ref[0:3, :]                              # (3, TP)
    pair_valid = pair_ref[3:4, :]                       # (1, TP)
    idx_i = pair_ref[4:5, :].astype(jnp.int32)          # exact small floats -> int
    idx_j = pair_ref[5:6, :].astype(jnp.int32)

    d2 = jnp.sum(rij * rij, axis=0, keepdims=True)      # (1, TP)
    inv_d = jax.lax.rsqrt(d2)                           # padded pairs have |r|=sqrt(3)>0
    d = d2 * inv_d

    # ---- fused gather: ONE (N, 2*TP) bf16 one-hot, ONE (8,N)x(N,2TP) matmul ----
    idx_ij = jnp.concatenate([idx_i, idx_j], axis=1)                     # (1, 2TP)
    atom_iota = jax.lax.broadcasted_iota(jnp.int32, (N, 2 * TP), 0)
    mask_bf = (atom_iota == idx_ij).astype(jnp.bfloat16)                 # exact 0/1
    g = jnp.dot(stack_ref[...], mask_bf, preferred_element_type=jnp.float32)  # (8, 2TP)
    gi = g[:, :TP]
    gj = g[:, TP:]
    qa_i, c6_i, r4r2_i = gi[0:1, :], gi[1:2, :], gi[2:3, :]
    qa_j, c6_j, r4r2_j = gj[0:1, :], gj[1:2, :], gj[2:3, :]

    # ---- ElectrostaticEnergy (smooth switch + long-range cutoff branch) ----
    x = (d - CUTON) * (1.0 / (SW_CUTOFF - CUTON))
    xp = jnp.where(x <= 0.0, 1.0, x)
    fp = jnp.where(x <= 0.0, 0.0, jnp.exp(-1.0 / xp))
    xm_in = 1.0 - x
    xm = jnp.where(xm_in <= 0.0, 1.0, xm_in)
    fm = jnp.where(xm_in <= 0.0, 0.0, jnp.exp(-1.0 / xm))
    ratio = fm * pl.reciprocal(fp + fm, approx=True)
    f = jnp.where(x <= 0.0, 1.0, jnp.where(x >= 1.0, 0.0, ratio))

    coulomb = jnp.where(d < LR_CUTOFF, inv_d + d * (1.0 / LR2) - TWO_DIV_CUT, 0.0)
    damped = jnp.where(d < LR_CUTOFF,
                       jax.lax.rsqrt(d2 + 1.0) + d * RCUTCONSTANT - CUTCONSTANT,
                       0.0)
    fac = KEHALF * qa_i * qa_j
    e_elec = fac * (f * damped + (1.0 - f) * coulomb)                    # (1, TP)

    # ---- D4-style two-body dispersion with BJ damping ----------------------
    # TODO(synk): full D4 (coordination-number Gaussian reference weighting,
    # tabulated refC6) needs the D4 parameter file; synthetic per-element
    # C6/r4r2 + zeta charge scaling are used instead.
    c6_ij = jnp.sqrt(jnp.maximum(c6_i * c6_j, 0.0))
    rr = 3.0 * r4r2_i * r4r2_j
    c8_ij = c6_ij * rr
    r0 = A1 * jnp.sqrt(rr) + A2
    d6 = d2 * d2 * d2
    d8 = d6 * d2
    r02 = r0 * r0
    r06 = r02 * r02 * r02
    r08 = r06 * r02
    e_disp = -0.5 * (S6 * c6_ij * pl.reciprocal(d6 + r06, approx=True)
                     + S8 * c8_ij * pl.reciprocal(d8 + r08, approx=True))
    e_disp = jnp.where(d < CUTOFF, e_disp, 0.0)

    e_pair = (e_elec + e_disp) * pair_valid                              # (1, TP)

    # ---- scatter-add to atoms: reuse the bf16 i-mask, bf16 energies, f32 acc ----
    contrib = jax.lax.dot_general(e_pair.astype(jnp.bfloat16), mask_bf[:, :TP],
                                  (((1,), (1,)), ((), ())),
                                  preferred_element_type=jnp.float32)    # (1, N)
    out_ref[...] = out_ref[...] + contrib.reshape(out_ref.shape)


# ------------------------------- wrapper -------------------------------------
def _round_up(x, m):
    return ((x + m - 1) // m) * m


def _chip_vmem_bytes():
    try:
        return int(pltpu.get_tpu_info().vmem_capacity_bytes)
    except Exception:
        return 64 * 1024 * 1024          # conservative (v7x-sized) fallback


def _budgets():
    vmem = _chip_vmem_bytes()
    if vmem >= 128 * 1024 * 1024:        # v5e / v6e: plenty of VMEM -> big tiles
        return 16 * 1024 * 1024, 96 * 1024 * 1024
    return 6 * 1024 * 1024, 40 * 1024 * 1024    # v7x (64 MiB) / unknown


def _choose_pair_tile(n_pad, pairs_per_shard, mask_budget_bytes):
    # Fused (N_PAD, 2*TP) mask temporaries: ~(4B i32 iota + ~4B bool + 2B bf16)
    # over N_PAD x 2*TP  ->  ~20 B per (N_PAD*TP) element; budget with 32 B/elem
    # for headroom (gathered (8,2TP) f32 result, double-buffered pair block).
    cap = max(128, (mask_budget_bytes // (32 * n_pad)) // 128 * 128)
    cap = min(cap, 4096)
    return min(cap, _round_up(max(pairs_per_shard, 1), 128))


def physnet_energy(yi, Z, r_ij, idx_i, idx_j, idx_m):
    n_atoms = int(Z.shape[0])
    n_pairs = int(idx_i.shape[0])
    num_batch = int(idx_m[-1]) + 1

    N_PAD = _round_up(max(n_atoms, 1), 128)
    B_PAD = _round_up(num_batch + 1, 8)      # +1 reserves a dummy molecule for padded atoms

    mask_budget, vmem_limit = _budgets()
    # Shard the pair tiles across TensorCores (v7x megacore). On 1-TC chips the
    # second shard simply runs sequentially (near-free: preprocessing is tiny).
    NUM_SHARDS = 2 if _round_up(max(n_pairs, 1), 128) // 128 >= 2 else 1
    pairs_per_shard = -(-max(n_pairs, 1) // NUM_SHARDS)
    TP = _choose_pair_tile(N_PAD, pairs_per_shard, mask_budget)
    P_PAD = _round_up(max(n_pairs, 1), TP * NUM_SHARDS)
    ppc = P_PAD // (TP * NUM_SHARDS)         # pair tiles per shard

    def pad1(x, n, value=0.0):
        x = jnp.asarray(x, jnp.float32)
        return jnp.pad(x, (0, n - x.shape[0]), constant_values=value)

    # ---- packed per-atom operand: (8, N_PAD) float32, one DMA, resident ------
    atom_f32 = jnp.stack([
        pad1(yi[:, 1], N_PAD),                              # 0: charge
        pad1(jnp.ones((n_atoms,), jnp.float32), N_PAD),     # 1: atom_valid
        pad1(yi[:, 0], N_PAD),                              # 2: per-atom energy
        pad1(idx_m.astype(jnp.float32), N_PAD,
             value=float(B_PAD - 1)),                       # 3: idx_m (exact small ints)
        pad1(C6_TABLE[Z], N_PAD),                           # 4: reference C6
        pad1(R4R2_TABLE[Z], N_PAD),                         # 5: r4r2
        pad1(ZEFF_TABLE[Z], N_PAD, value=1.0),              # 6: Z_eff
        jnp.zeros((N_PAD,), jnp.float32),                   # 7: spare
    ], axis=0)

    # ---- single packed per-pair operand: (8, P_PAD) float32 ------------------
    rij_p = jnp.pad(r_ij.astype(jnp.float32), ((0, P_PAD - n_pairs), (0, 0)),
                    constant_values=1.0)                    # padded pairs: |r| = sqrt(3)
    pair_f32 = jnp.concatenate([
        rij_p.T,                                                             # 0-2: r_xyz
        pad1(jnp.ones((n_pairs,), jnp.float32), P_PAD)[None, :],             # 3: pair_valid
        pad1(idx_i.astype(jnp.float32), P_PAD, value=float(N_PAD - 1))[None, :],  # 4: idx_i
        pad1(idx_j.astype(jnp.float32), P_PAD, value=float(N_PAD - 1))[None, :],  # 5: idx_j
        jnp.zeros((2, P_PAD), jnp.float32),                                  # 6-7: spare
    ], axis=0)                                              # (8, P_PAD)

    kernel = functools.partial(physnet_energy_kernel, num_mol_pad=B_PAD)
    out = pl.pallas_call(
        kernel,
        out_shape=jax.ShapeDtypeStruct((NUM_SHARDS, 1, N_PAD), jnp.float32),
        grid=(NUM_SHARDS, ppc),
        in_specs=[
            pl.BlockSpec((8, TP), lambda c, p, _ppc=ppc: (0, c * _ppc + p)),  # pair block
            pl.BlockSpec((8, N_PAD), lambda c, p: (0, 0)),                    # atoms (resident)
        ],
        out_specs=pl.BlockSpec((1, 1, N_PAD), lambda c, p: (c, 0, 0)),        # per-shard accum
        scratch_shapes=[pltpu.VMEM((8, N_PAD), jnp.bfloat16)],                # bf16 qa/c6/r4r2
        compiler_params=pltpu.CompilerParams(
            dimension_semantics=("parallel", "arbitrary"),
            vmem_limit_bytes=vmem_limit),
    )(pair_f32, atom_f32)

    total = out.sum(axis=0)[0]                              # (N_PAD,)
    return total[:n_atoms, None]                            # (n_atoms, 1)


# --------------------------------- main ---------------------------------------
def _build_example(key, mol_sizes):
    n_atoms = sum(mol_sizes)
    k1, k2, k3 = jax.random.split(key, 3)
    yi = jax.random.normal(k1, (n_atoms, 2), dtype=jnp.float32)     # [:,0]=energy, [:,1]=charge
    Z = jax.random.randint(k2, (n_atoms,), 1, 10)                   # atomic numbers
    positions = 4.0 * jax.random.normal(k3, (n_atoms, 3), dtype=jnp.float32)

    # intra-molecular full neighbor lists (i != j), per-atom molecule index
    idx_i_list, idx_j_list, idx_m_list = [], [], []
    off = 0
    for m, s in enumerate(mol_sizes):
        idx_m_list += [m] * s
        for a in range(s):
            for b in range(s):
                if a != b:
                    idx_i_list.append(off + a)
                    idx_j_list.append(off + b)
        off += s
    idx_i = jnp.array(idx_i_list, dtype=jnp.int32)
    idx_j = jnp.array(idx_j_list, dtype=jnp.int32)
    idx_m = jnp.array(idx_m_list, dtype=jnp.int32)
    r_ij = positions[idx_j] - positions[idx_i]                       # (n_pairs, 3)
    return yi, Z, r_ij, idx_i, idx_j, idx_m


if __name__ == "__main__":
    # Small case: 2 molecules (3 + 5 atoms) -> single shard, single pair tile.
    args_small = _build_example(jax.random.PRNGKey(0), [3, 5])
    out_small = jax.block_until_ready(physnet_energy(*args_small))
    assert out_small.shape == (8, 1)
    assert bool(jnp.all(jnp.isfinite(out_small)))

    # Larger case: 2 molecules of 68 atoms (9112 pairs) -> exercises the
    # 2-shard "parallel" axis and multi-tile accumulation along the
    # "arbitrary" pair axis on every chip generation.
    args_big = _build_example(jax.random.PRNGKey(0), [68, 68])
    out_big = jax.block_until_ready(physnet_energy(*args_big))
    assert out_big.shape == (136, 1)
    assert bool(jnp.all(jnp.isfinite(out_big)))

    print("KERNEL_OK")
</pallas_src>

<mosaic_0001>
module attributes {stable_mosaic.version = 11 : i64} {
  func.func @physnet_energy_kernel(%arg0: i32, %arg1: i32, %arg2: memref<8x128xf32, #tpu.memory_space<vmem>>, %arg3: memref<8x128xf32, #tpu.memory_space<vmem>>, %arg4: memref<1x1x128xf32, #tpu.memory_space<vmem>>, %arg5: memref<8x128xbf16, #tpu.memory_space<vmem>>) attributes {dimension_semantics = [#tpu.dimension_semantics<parallel>, #tpu.dimension_semantics<arbitrary>], iteration_bounds = array<i64: 1, 1>, scalar_prefetch = 0 : i64, scratch_operands = 1 : i64, tpu.core_type = #tpu.core_type<tc>, window_params = [{transform_indices = @transform_0, window_bounds = array<i64: 8, 128>}, {pipeline_mode = #tpu.pipeline_mode<synchronous>, transform_indices = @transform_1, window_bounds = array<i64: 8, 128>}, {transform_indices = @transform_2, window_bounds = array<i64: 1, 1, 128>}]} {
    %c0_i32 = arith.constant 0 : i32
    %0 = arith.cmpi eq, %arg1, %c0_i32 : i32
    %1 = arith.extui %0 : i1 to i32
    %c0_i32_0 = arith.constant 0 : i32
    %2 = arith.cmpi ne, %1, %c0_i32_0 : i32
    scf.if %2 {
      %c0_52 = arith.constant 0 : index
      %c0_53 = arith.constant 0 : index
      %146 = vector.load %arg3[%c0_52, %c0_53] : memref<8x128xf32, #tpu.memory_space<vmem>>, vector<1x128xf32>
      %c2 = arith.constant 2 : index
      %c0_54 = arith.constant 0 : index
      %147 = vector.load %arg3[%c2, %c0_54] : memref<8x128xf32, #tpu.memory_space<vmem>>, vector<1x128xf32>
      %c3_55 = arith.constant 3 : index
      %c0_56 = arith.constant 0 : index
      %148 = vector.load %arg3[%c3_55, %c0_56] : memref<8x128xf32, #tpu.memory_space<vmem>>, vector<1x128xf32>
      %149 = arith.fptosi %148 : vector<1x128xf32> to vector<1x128xi32>
      %c4_57 = arith.constant 4 : index
      %c0_58 = arith.constant 0 : index
      %150 = vector.load %arg3[%c4_57, %c0_58] : memref<8x128xf32, #tpu.memory_space<vmem>>, vector<1x128xf32>
      %c5_59 = arith.constant 5 : index
      %c0_60 = arith.constant 0 : index
      %151 = vector.load %arg3[%c5_59, %c0_60] : memref<8x128xf32, #tpu.memory_space<vmem>>, vector<1x128xf32>
      %c6 = arith.constant 6 : index
      %c0_61 = arith.constant 0 : index
      %152 = vector.load %arg3[%c6, %c0_61] : memref<8x128xf32, #tpu.memory_space<vmem>>, vector<1x128xf32>
      %153 = tpu.iota {dimensions = array<i32: 0>} : vector<8x128xi32>
      %154 = vector.broadcast %149 : vector<1x128xi32> to vector<8x128xi32>
      %155 = arith.cmpi eq, %153, %154 : vector<8x128xi32>
      %156 = arith.extui %155 : vector<8x128xi1> to vector<8x128xi32>
      %157 = arith.sitofp %156 : vector<8x128xi32> to vector<8x128xf32>
      %c0_62 = arith.constant 0 : index
      %c0_63 = arith.constant 0 : index
      %158 = vector.load %arg3[%c0_62, %c0_63] : memref<8x128xf32, #tpu.memory_space<vmem>>, vector<2x128xf32>
      %cst_64 = arith.constant dense<0.000000e+00> : vector<2x8xf32>
      %159 = tpu.matmul %158, %157, %cst_64 {dimension_numbers = #tpu.dot_dimension_numbers<[1], [1], [0], [0], [0, 0, 1, 0], [], []>} : vector<2x128xf32>, vector<8x128xf32>, vector<2x8xf32> -> vector<2x8xf32>
      %cst_65 = arith.constant dense<0.000000e+00> : vector<2x128xf32>
      %160 = tpu.matmul %159, %157, %cst_65 {dimension_numbers = #tpu.dot_dimension_numbers<[1], [0], [0], [1], [0, 0, 1, 1], [], []>} : vector<2x8xf32>, vector<8x128xf32>, vector<2x128xf32> -> vector<2x128xf32>
      %161 = vector.extract_strided_slice %160 {offsets = [0, 0], sizes = [1, 128], strides = [1, 1]} : vector<2x128xf32> to vector<1x128xf32>
      %162 = vector.extract_strided_slice %160 {offsets = [1, 0], sizes = [1, 128], strides = [1, 1]} : vector<2x128xf32> to vector<1x128xf32>
      %cst_66 = arith.constant 1.000000e+00 : f32
      %163 = vector.broadcast %cst_66 : f32 to vector<1x128xf32>
      %164 = arith.maximumf %162, %163 : vector<1x128xf32>
      %cst_67 = arith.constant 1.000000e+00 : f32
      %165 = vector.broadcast %cst_67 : f32 to vector<1x128xf32>
      %166 = arith.divf %165, %164 : vector<1x128xf32>
      %167 = arith.mulf %161, %166 : vector<1x128xf32>
      %168 = arith.subf %146, %167 : vector<1x128xf32>
      %169 = arith.addf %152, %168 : vector<1x128xf32>
      %cst_68 = arith.constant 0.000000e+00 : f32
      %170 = vector.broadcast %cst_68 : f32 to vector<1x128xf32>
      %171 = arith.cmpf ogt, %169, %170 : vector<1x128xf32>
      %cst_69 = arith.constant 1.000000e+00 : f32
      %172 = vector.broadcast %cst_69 : f32 to vector<1x128xf32>
      %173 = arith.select %171, %169, %172 : vector<1x128xi1>, vector<1x128xf32>
      %cst_70 = arith.constant 0.000000e+00 : f32
      %174 = vector.broadcast %cst_70 : f32 to vector<1x128xf32>
      %175 = arith.cmpf ogt, %169, %174 : vector<1x128xf32>
      %176 = arith.divf %152, %173 : vector<1x128xf32>
      %cst_71 = arith.constant 1.000000e+00 : f32
      %177 = vector.broadcast %cst_71 : f32 to vector<1x128xf32>
      %178 = arith.subf %177, %176 : vector<1x128xf32>
      %cst_72 = arith.constant 2.000000e+00 : f32
      %179 = vector.broadcast %cst_72 : f32 to vector<1x128xf32>
      %180 = arith.mulf %179, %178 : vector<1x128xf32>
      %181 = math.exp %180 : vector<1x128xf32>
      %cst_73 = arith.constant 1.000000e+00 : f32
      %182 = vector.broadcast %cst_73 : f32 to vector<1x128xf32>
      %183 = arith.subf %182, %181 : vector<1x128xf32>
      %cst_74 = arith.constant 3.000000e+00 : f32
      %184 = vector.broadcast %cst_74 : f32 to vector<1x128xf32>
      %185 = arith.mulf %184, %183 : vector<1x128xf32>
      %186 = math.exp %185 : vector<1x128xf32>
      %cst_75 = arith.constant 3.000000e+00 : f32
      %187 = math.exp %cst_75 : f32
      %188 = vector.broadcast %187 : f32 to vector<1x128xf32>
      %189 = arith.select %175, %186, %188 : vector<1x128xi1>, vector<1x128xf32>
      %190 = arith.mulf %150, %189 : vector<1x128xf32>
      %191 = arith.mulf %190, %189 : vector<1x128xf32>
      %cst_76 = arith.constant 0.000000e+00 : f32
      %192 = vector.broadcast %cst_76 : f32 to vector<5x128xf32>
      %193 = tpu.concatenate %168, %191, %151, %192 in 0 : vector<1x128xf32>, vector<1x128xf32>, vector<1x128xf32>, vector<5x128xf32> -> vector<8x128xf32>
      %194 = arith.truncf %193 : vector<8x128xf32> to vector<8x128xbf16>
      %c0_77 = arith.constant 0 : index
      %c0_78 = arith.constant 0 : index
      %195 = vector.load %arg5[%c0_77, %c0_78] : memref<8x128xbf16, #tpu.memory_space<vmem>>, vector<8x128xbf16>
      tpu.vector_store %arg5[%c0_77, %c0_78], %194 {strides = array<i32>} : memref<8x128xbf16, #tpu.memory_space<vmem>>, vector<8x128xbf16>,
      %c0_i32_79 = arith.constant 0 : i32
      %196 = arith.cmpi eq, %arg0, %c0_i32_79 : i32
      %197 = arith.extui %196 : i1 to i32
      %198 = arith.sitofp %197 : i32 to f32
      %199 = vector.broadcast %198 : f32 to vector<1x128xf32>
      %200 = arith.mulf %147, %199 : vector<1x128xf32>
      %201 = vector.shape_cast %200 : vector<1x128xf32> to vector<1x1x128xf32>
      %c0_80 = arith.constant 0 : index
      %c0_81 = arith.constant 0 : index
      %c0_82 = arith.constant 0 : index
      %202 = vector.load %arg4[%c0_80, %c0_81, %c0_82] : memref<1x1x128xf32, #tpu.memory_space<vmem>>, vector<1x1x128xf32>
      tpu.vector_store %arg4[%c0_80, %c0_81, %c0_82], %201 {strides = array<i32>} : memref<1x1x128xf32, #tpu.memory_space<vmem>>, vector<1x1x128xf32>,
    } else {
    }
    %c0 = arith.constant 0 : index
    %c0_1 = arith.constant 0 : index
    %3 = vector.load %arg2[%c0, %c0_1] : memref<8x128xf32, #tpu.memory_space<vmem>>, vector<3x128xf32>
    %c3 = arith.constant 3 : index
    %c0_2 = arith.constant 0 : index
    %4 = vector.load %arg2[%c3, %c0_2] : memref<8x128xf32, #tpu.memory_space<vmem>>, vector<1x128xf32>
    %c4 = arith.constant 4 : index
    %c0_3 = arith.constant 0 : index
    %5 = vector.load %arg2[%c4, %c0_3] : memref<8x128xf32, #tpu.memory_space<vmem>>, vector<1x128xf32>
    %6 = arith.fptosi %5 : vector<1x128xf32> to vector<1x128xi32>
    %c5 = arith.constant 5 : index
    %c0_4 = arith.constant 0 : index
    %7 = vector.load %arg2[%c5, %c0_4] : memref<8x128xf32, #tpu.memory_space<vmem>>, vector<1x128xf32>
    %8 = arith.fptosi %7 : vector<1x128xf32> to vector<1x128xi32>
    %9 = arith.mulf %3, %3 : vector<3x128xf32>
    %cst = arith.constant dense<0.000000e+00> : vector<128xf32>
    %10 = vector.multi_reduction <add>, %9, %cst [0] : vector<3x128xf32> to vector<128xf32>
    %11 = vector.shape_cast %10 : vector<128xf32> to vector<1x128xf32>
    %12 = math.rsqrt %11 : vector<1x128xf32>
    %13 = arith.mulf %11, %12 : vector<1x128xf32>
    %14 = tpu.concatenate %6, %8 in 1 : vector<1x128xi32>, vector<1x128xi32> -> vector<1x256xi32>
    %15 = tpu.iota {dimensions = array<i32: 0>} : vector<128x256xi32>
    %16 = vector.broadcast %14 : vector<1x256xi32> to vector<128x256xi32>
    %17 = arith.cmpi eq, %15, %16 : vector<128x256xi32>
    %18 = arith.extui %17 : vector<128x256xi1> to vector<128x256xi32>
    %19 = arith.sitofp %18 : vector<128x256xi32> to vector<128x256xf32>
    %20 = arith.truncf %19 : vector<128x256xf32> to vector<128x256xbf16>
    %c0_5 = arith.constant 0 : index
    %c0_6 = arith.constant 0 : index
    %21 = vector.load %arg5[%c0_5, %c0_6] : memref<8x128xbf16, #tpu.memory_space<vmem>>, vector<8x128xbf16>
    %cst_7 = arith.constant dense<0.000000e+00> : vector<8x256xf32>
    %22 = tpu.matmul %21, %20, %cst_7 {dimension_numbers = #tpu.dot_dimension_numbers<[1], [0], [0], [1], [0, 0, 1, 1], [], []>} : vector<8x128xbf16>, vector<128x256xbf16>, vector<8x256xf32> -> vector<8x256xf32>
    %23 = vector.extract_strided_slice %22 {offsets = [0, 0], sizes = [8, 128], strides = [1, 1]} : vector<8x256xf32> to vector<8x128xf32>
    %24 = vector.extract_strided_slice %22 {offsets = [0, 128], sizes = [8, 128], strides = [1, 1]} : vector<8x256xf32> to vector<8x128xf32>
    %25 = vector.extract_strided_slice %23 {offsets = [0, 0], sizes = [1, 128], strides = [1, 1]} : vector<8x128xf32> to vector<1x128xf32>
    %26 = vector.extract_strided_slice %23 {offsets = [1, 0], sizes = [1, 128], strides = [1, 1]} : vector<8x128xf32> to vector<1x128xf32>
    %27 = vector.extract_strided_slice %23 {offsets = [2, 0], sizes = [1, 128], strides = [1, 1]} : vector<8x128xf32> to vector<1x128xf32>
    %28 = vector.extract_strided_slice %24 {offsets = [0, 0], sizes = [1, 128], strides = [1, 1]} : vector<8x128xf32> to vector<1x128xf32>
    %29 = vector.extract_strided_slice %24 {offsets = [1, 0], sizes = [1, 128], strides = [1, 1]} : vector<8x128xf32> to vector<1x128xf32>
    %30 = vector.extract_strided_slice %24 {offsets = [2, 0], sizes = [1, 128], strides = [1, 1]} : vector<8x128xf32> to vector<1x128xf32>
    %cst_8 = arith.constant 2.500000e+00 : f32
    %31 = vector.broadcast %cst_8 : f32 to vector<1x128xf32>
    %32 = arith.subf %13, %31 : vector<1x128xf32>
    %cst_9 = arith.constant 2.000000e-01 : f32
    %33 = vector.broadcast %cst_9 : f32 to vector<1x128xf32>
    %34 = arith.mulf %32, %33 : vector<1x128xf32>
    %cst_10 = arith.constant 0.000000e+00 : f32
    %35 = vector.broadcast %cst_10 : f32 to vector<1x128xf32>
    %36 = arith.cmpf ole, %34, %35 : vector<1x128xf32>
    %cst_11 = arith.constant 1.000000e+00 : f32
    %37 = vector.broadcast %cst_11 : f32 to vector<1x128xf32>
    %38 = arith.select %36, %37, %34 : vector<1x128xi1>, vector<1x128xf32>
    %cst_12 = arith.constant 0.000000e+00 : f32
    %39 = vector.broadcast %cst_12 : f32 to vector<1x128xf32>
    %40 = arith.cmpf ole, %34, %39 : vector<1x128xf32>
    %cst_13 = arith.constant -1.000000e+00 : f32
    %41 = vector.broadcast %cst_13 : f32 to vector<1x128xf32>
    %42 = arith.divf %41, %38 : vector<1x128xf32>
    %43 = math.exp %42 : vector<1x128xf32>
    %cst_14 = arith.constant 0.000000e+00 : f32
    %44 = vector.broadcast %cst_14 : f32 to vector<1x128xf32>
    %45 = arith.select %40, %44, %43 : vector<1x128xi1>, vector<1x128xf32>
    %cst_15 = arith.constant 1.000000e+00 : f32
    %46 = vector.broadcast %cst_15 : f32 to vector<1x128xf32>
    %47 = arith.subf %46, %34 : vector<1x128xf32>
    %cst_16 = arith.constant 0.000000e+00 : f32
    %48 = vector.broadcast %cst_16 : f32 to vector<1x128xf32>
    %49 = arith.cmpf ole, %47, %48 : vector<1x128xf32>
    %cst_17 = arith.constant 1.000000e+00 : f32
    %50 = vector.broadcast %cst_17 : f32 to vector<1x128xf32>
    %51 = arith.select %49, %50, %47 : vector<1x128xi1>, vector<1x128xf32>
    %cst_18 = arith.constant 0.000000e+00 : f32
    %52 = vector.broadcast %cst_18 : f32 to vector<1x128xf32>
    %53 = arith.cmpf ole, %47, %52 : vector<1x128xf32>
    %cst_19 = arith.constant -1.000000e+00 : f32
    %54 = vector.broadcast %cst_19 : f32 to vector<1x128xf32>
    %55 = arith.divf %54, %51 : vector<1x128xf32>
    %56 = math.exp %55 : vector<1x128xf32>
    %cst_20 = arith.constant 0.000000e+00 : f32
    %57 = vector.broadcast %cst_20 : f32 to vector<1x128xf32>
    %58 = arith.select %53, %57, %56 : vector<1x128xi1>, vector<1x128xf32>
    %59 = arith.addf %45, %58 : vector<1x128xf32>
    %60 = tpu.reciprocal %59 {approx = true} : vector<1x128xf32> -> vector<1x128xf32>
    %61 = arith.mulf %58, %60 : vector<1x128xf32>
    %cst_21 = arith.constant 0.000000e+00 : f32
    %62 = vector.broadcast %cst_21 : f32 to vector<1x128xf32>
    %63 = arith.cmpf ole, %34, %62 : vector<1x128xf32>
    %cst_22 = arith.constant 1.000000e+00 : f32
    %64 = vector.broadcast %cst_22 : f32 to vector<1x128xf32>
    %65 = arith.cmpf oge, %34, %64 : vector<1x128xf32>
    %cst_23 = arith.constant 0.000000e+00 : f32
    %66 = vector.broadcast %cst_23 : f32 to vector<1x128xf32>
    %67 = arith.select %65, %66, %61 : vector<1x128xi1>, vector<1x128xf32>
    %cst_24 = arith.constant 1.000000e+00 : f32
    %68 = vector.broadcast %cst_24 : f32 to vector<1x128xf32>
    %69 = arith.select %63, %68, %67 : vector<1x128xi1>, vector<1x128xf32>
    %cst_25 = arith.constant 1.000000e+01 : f32
    %70 = vector.broadcast %cst_25 : f32 to vector<1x128xf32>
    %71 = arith.cmpf olt, %13, %70 : vector<1x128xf32>
    %cst_26 = arith.constant 0.00999999977 : f32
    %72 = vector.broadcast %cst_26 : f32 to vector<1x128xf32>
    %73 = arith.mulf %13, %72 : vector<1x128xf32>
    %74 = arith.addf %12, %73 : vector<1x128xf32>
    %cst_27 = arith.constant 2.000000e-01 : f32
    %75 = vector.broadcast %cst_27 : f32 to vector<1x128xf32>
    %76 = arith.subf %74, %75 : vector<1x128xf32>
    %cst_28 = arith.constant 0.000000e+00 : f32
    %77 = vector.broadcast %cst_28 : f32 to vector<1x128xf32>
    %78 = arith.select %71, %76, %77 : vector<1x128xi1>, vector<1x128xf32>
    %cst_29 = arith.constant 1.000000e+01 : f32
    %79 = vector.broadcast %cst_29 : f32 to vector<1x128xf32>
    %80 = arith.cmpf olt, %13, %79 : vector<1x128xf32>
    %cst_30 = arith.constant 1.000000e+00 : f32
    %81 = vector.broadcast %cst_30 : f32 to vector<1x128xf32>
    %82 = arith.addf %11, %81 : vector<1x128xf32>
    %83 = math.rsqrt %82 : vector<1x128xf32>
    %cst_31 = arith.constant 0.00985185336 : f32
    %84 = vector.broadcast %cst_31 : f32 to vector<1x128xf32>
    %85 = arith.mulf %13, %84 : vector<1x128xf32>
    %86 = arith.addf %83, %85 : vector<1x128xf32>
    %cst_32 = arith.constant 0.198022246 : f32
    %87 = vector.broadcast %cst_32 : f32 to vector<1x128xf32>
    %88 = arith.subf %86, %87 : vector<1x128xf32>
    %cst_33 = arith.constant 0.000000e+00 : f32
    %89 = vector.broadcast %cst_33 : f32 to vector<1x128xf32>
    %90 = arith.select %80, %88, %89 : vector<1x128xi1>, vector<1x128xf32>
    %cst_34 = arith.constant 7.1998229 : f32
    %91 = vector.broadcast %cst_34 : f32 to vector<1x128xf32>
    %92 = arith.mulf %91, %25 : vector<1x128xf32>
    %93 = arith.mulf %92, %28 : vector<1x128xf32>
    %94 = arith.mulf %69, %90 : vector<1x128xf32>
    %cst_35 = arith.constant 1.000000e+00 : f32
    %95 = vector.broadcast %cst_35 : f32 to vector<1x128xf32>
    %96 = arith.subf %95, %69 : vector<1x128xf32>
    %97 = arith.mulf %96, %78 : vector<1x128xf32>
    %98 = arith.addf %94, %97 : vector<1x128xf32>
    %99 = arith.mulf %93, %98 : vector<1x128xf32>
    %100 = arith.mulf %26, %29 : vector<1x128xf32>
    %cst_36 = arith.constant 0.000000e+00 : f32
    %101 = vector.broadcast %cst_36 : f32 to vector<1x128xf32>
    %102 = arith.maximumf %100, %101 : vector<1x128xf32>
    %103 = math.sqrt %102 : vector<1x128xf32>
    %cst_37 = arith.constant 3.000000e+00 : f32
    %104 = vector.broadcast %cst_37 : f32 to vector<1x128xf32>
    %105 = arith.mulf %104, %27 : vector<1x128xf32>
    %106 = arith.mulf %105, %30 : vector<1x128xf32>
    %107 = arith.mulf %103, %106 : vector<1x128xf32>
    %108 = math.sqrt %106 : vector<1x128xf32>
    %cst_38 = arith.constant 4.000000e-01 : f32
    %109 = vector.broadcast %cst_38 : f32 to vector<1x128xf32>
    %110 = arith.mulf %109, %108 : vector<1x128xf32>
    %cst_39 = arith.constant 4.500000e+00 : f32
    %111 = vector.broadcast %cst_39 : f32 to vector<1x128xf32>
    %112 = arith.addf %110, %111 : vector<1x128xf32>
    %113 = arith.mulf %11, %11 : vector<1x128xf32>
    %114 = arith.mulf %113, %11 : vector<1x128xf32>
    %115 = arith.mulf %114, %11 : vector<1x128xf32>
    %116 = arith.mulf %112, %112 : vector<1x128xf32>
    %117 = arith.mulf %116, %116 : vector<1x128xf32>
    %118 = arith.mulf %117, %116 : vector<1x128xf32>
    %119 = arith.mulf %118, %116 : vector<1x128xf32>
    %cst_40 = arith.constant 1.000000e+00 : f32
    %120 = vector.broadcast %cst_40 : f32 to vector<1x128xf32>
    %121 = arith.mulf %120, %103 : vector<1x128xf32>
    %122 = arith.addf %114, %118 : vector<1x128xf32>
    %123 = tpu.reciprocal %122 {approx = true} : vector<1x128xf32> -> vector<1x128xf32>
    %124 = arith.mulf %121, %123 : vector<1x128xf32>
    %cst_41 = arith.constant 1.200000e+00 : f32
    %125 = vector.broadcast %cst_41 : f32 to vector<1x128xf32>
    %126 = arith.mulf %125, %107 : vector<1x128xf32>
    %127 = arith.addf %115, %119 : vector<1x128xf32>
    %128 = tpu.reciprocal %127 {approx = true} : vector<1x128xf32> -> vector<1x128xf32>
    %129 = arith.mulf %126, %128 : vector<1x128xf32>
    %130 = arith.addf %124, %129 : vector<1x128xf32>
    %cst_42 = arith.constant -5.000000e-01 : f32
    %131 = vector.broadcast %cst_42 : f32 to vector<1x128xf32>
    %132 = arith.mulf %131, %130 : vector<1x128xf32>
    %cst_43 = arith.constant 1.000000e+01 : f32
    %133 = vector.broadcast %cst_43 : f32 to vector<1x128xf32>
    %134 = arith.cmpf olt, %13, %133 : vector<1x128xf32>
    %cst_44 = arith.constant 0.000000e+00 : f32
    %135 = vector.broadcast %cst_44 : f32 to vector<1x128xf32>
    %136 = arith.select %134, %132, %135 : vector<1x128xi1>, vector<1x128xf32>
    %137 = arith.addf %99, %136 : vector<1x128xf32>
    %138 = arith.mulf %137, %4 : vector<1x128xf32>
    %139 = arith.truncf %138 : vector<1x128xf32> to vector<1x128xbf16>
    %140 = vector.extract_strided_slice %20 {offsets = [0, 0], sizes = [128, 128], strides = [1, 1]} : vector<128x256xbf16> to vector<128x128xbf16>
    %cst_45 = arith.constant dense<0.000000e+00> : vector<1x128xf32>
    %141 = tpu.matmul %139, %140, %cst_45 {dimension_numbers = #tpu.dot_dimension_numbers<[1], [1], [0], [0], [0, 0, 1, 0], [], []>} : vector<1x128xbf16>, vector<128x128xbf16>, vector<1x128xf32> -> vector<1x128xf32>
    %c0_46 = arith.constant 0 : index
    %c0_47 = arith.constant 0 : index
    %c0_48 = arith.constant 0 : index
    %142 = vector.load %arg4[%c0_46, %c0_47, %c0_48] : memref<1x1x128xf32, #tpu.memory_space<vmem>>, vector<1x1x128xf32>
    %143 = vector.shape_cast %141 : vector<1x128xf32> to vector<1x1x128xf32>
    %144 = arith.addf %142, %143 : vector<1x1x128xf32>
    %c0_49 = arith.constant 0 : index
    %c0_50 = arith.constant 0 : index
    %c0_51 = arith.constant 0 : index
    %145 = vector.load %arg4[%c0_49, %c0_50, %c0_51] : memref<1x1x128xf32, #tpu.memory_space<vmem>>, vector<1x1x128xf32>
    tpu.vector_store %arg4[%c0_49, %c0_50, %c0_51], %144 {strides = array<i32>} : memref<1x1x128xf32, #tpu.memory_space<vmem>>, vector<1x1x128xf32>,
    return
  }
  func.func @transform_0(%arg0: i32, %arg1: i32) -> (i32, i32) {
    %c1_i32 = arith.constant 1 : i32
    %0 = arith.muli %arg0, %c1_i32 : i32
    %1 = arith.addi %0, %arg1 : i32
    %c0_i32 = arith.constant 0 : i32
    %c0_i32_0 = arith.constant 0 : i32
    return %c0_i32, %1 : i32, i32
  }
  func.func @transform_1(%arg0: i32, %arg1: i32) -> (i32, i32) {
    %c0_i32 = arith.constant 0 : i32
    %c0_i32_0 = arith.constant 0 : i32
    %c0_i32_1 = arith.constant 0 : i32
    return %c0_i32, %c0_i32_0 : i32, i32
  }
  func.func @transform_2(%arg0: i32, %arg1: i32) -> (i32, i32, i32) {
    %c0_i32 = arith.constant 0 : i32
    %c0_i32_0 = arith.constant 0 : i32
    %c0_i32_1 = arith.constant 0 : i32
    return %arg0, %c0_i32, %c0_i32_0 : i32, i32, i32
  }
}

</mosaic_0001>

<bundles_post_ra>
// kernel: tpu_custom_call.1
= control target key start
LH: loop header
LB: loop body
LE: loop exit
PB: predicated region body
PF: predicated region fallthrough
CT: control target
= control target key end

     0   :  { %7 = vsyncpa [#allocation4], 0  ;;  %s1014_s0 = inlined_call_operand.hbm [shape: f32[8,128], index: 0, kind: input, shape index: {}]   ;;  %s1015_s1 = inlined_call_operand.hbm [shape: f32[8,128], index: 1, kind: input, shape index: {}]   ;;  %s1016_s2 = inlined_call_operand.hbm [shape: f32[1,1,128], index: 2, kind: output, shape index: {}]  }
   0x1   :  { %8 = vsyncpa [#allocation7], 0 }
   0x2   :  { %9 = vsyncpa [#allocation5], 0  ;;  %s18_s11 = sshll.u32 %s1014_s0, 4  ;;  %s780_s12 = smov [#allocation3]   ;;  %s19_s11 = int_to_ptr.hbm [resolvable:$true] %s18_s11 }
   0x3   :  { %s20_s13 = sshll.u32 %s780_s12, 4  ;;  %s29_s16 = sshll.u32 %s1015_s1, 4  ;;  %s21_s13 = int_to_ptr.vmem [resolvable:$true] %s20_s13  ;;  %s30_s16 = int_to_ptr.hbm [resolvable:$true] %s29_s16 }
   0x4   :  { %23 = dma.hbm_to_vmem [thread:$0]  %s19_s11, 128, %s21_s13, [#allocation4]  }
   0x5   :  { %s781_s17 = smov [#allocation6]  }
   0x6   :  { %s31_s18 = sshll.u32 %s781_s17, 4  ;;  %s32_s18 = int_to_ptr.vmem [resolvable:$true] %s31_s18 }
   0x7   :  { %34 = dma.hbm_to_vmem [thread:$0]  %s30_s16, 128, %s32_s18, [#allocation7]  }
   0x8   :  { %774 = dma.done.wait [#allocation4], 128  }
   0x9   :  { %775 = vsyncadd [#allocation4], 4294967168 }
   0xa   :  { %776 = dma.done.wait [#allocation7], 128  }
   0xb   :  { %777 = vsyncadd [#allocation7], 4294967168  ;;  %v50_v0 = vld [vmem:[#allocation6 + $0x3] sm:$0x1]  ;;  %v55_v1 = vlaneseq  ;;  %v782_v8 = vmov 1.0   ;;  %vm82_vm2 = vcmask 64512  }
   0xc   :  { %vm652_vm0 = vcmp.lt.s32.totalorder %v50_v0, 0  ;;  %v653_v2 = vceil.f32 %v50_v0  ;;  %v654_v3 = vfloor.f32 %v50_v0  ;;  %v61_v9 = vld [vmem:[#allocation6] sm:$0x3]  ;;  %v178_v21 = vld [vmem:[#allocation3 + $0x4] sm:$0x1]  ;;  %v783_v42 = vmov 0.0  }
   0xd   :  { %v806_v6 = vshrl.u32 %v55_v1, 7  ;;  %v180_v22 = vld [vmem:[#allocation3 + $0x5] sm:$0x1]  ;;  %v658_v23 = vceil.f32 %v178_v21  ;;  %v659_v24 = vfloor.f32 %v178_v21  ;;  %vm657_vm7 = vcmp.lt.s32.totalorder %v178_v21, 0  ;;  %v48_v34 = vld [vmem:[#allocation6] sm:$0x1] }
   0xe   :  { %v655_v4 = vsel %vm652_vm0, %v653_v2, %v654_v3  ;;  %v663_v25 = vceil.f32 %v180_v22  ;;  %v664_v26 = vfloor.f32 %v180_v22  ;;  %vm662_vm8 = vcmp.lt.s32.totalorder %v180_v22, 0  ;;  %v813_v39 = vld [vmem:[#allocation6 + $0x6] sm:$0x1]  ;;  %s784_s0 = smov [#allocation8]   ;;  %s602_s21 = sshll.u32 %s1016_s2, 4  ;;  %s603_s21 = int_to_ptr.hbm [resolvable:$true] %s602_s21 }
   0xf   :  { %v656_v5 = vcvt.f32.s32 %v655_v4  ;;  %v660_v29 = vsel %vm657_vm7, %v658_v23, %v659_v24  ;;  %v217_v36 = vadd.s32 112, %v806_v6  ;;  %v218_v37 = vadd.s32 120, %v806_v6  ;;  %s600_s1 = sshll.u32 %s784_s0, 4  ;;  %s601_s1 = int_to_ptr.vmem [resolvable:$true] %s600_s1 }
  0x10   :  { %v665_v30 = vsel %vm662_vm8, %v663_v25, %v664_v26  ;;  %v661_v32 = vcvt.f32.s32 %v660_v29  ;;  %v215_v48 = vadd.s32 96, %v806_v6  ;;  %v216_v51 = vadd.s32 104, %v806_v6 }
  0x11   :  { %v57_v7 = vperm.slane %v656_v5, 0  ;;  %v666_v33 = vcvt.f32.s32 %v665_v30  ;;  %v213_v4 = vadd.s32 80, %v806_v6  ;;  %v214_v5 = vadd.s32 88, %v806_v6 }
  0x12   :  { %v811_v38 = vperm.slane %v661_v32, 0  ;;  %v209_v25 = vadd.s32 48, %v806_v6 }
  0x13   :  { %vm58_vm1 = vcmp.eq.s32.totalorder %v806_v6, %v57_v7  ;;  %v815_v40 = vperm.slane %v666_v33, 0 }
  0x14   :  { %614 = vmatpush.xpose.msk.msra.mxu0 %vm58_vm1, %v782_v8  ;;  %vm249_vm9 = vcmp.eq.s32.totalorder %v217_v36, %v811_v38  ;;  %vm251_vm10 = vcmp.eq.s32.totalorder %v218_v37, %v811_v38  ;;  %vm245_vm14 = vcmp.eq.s32.totalorder %v215_v48, %v811_v38  ;;  %vm247_vm0 = vcmp.eq.s32.totalorder %v216_v51, %v811_v38 }
  0x15   :  { %vm250_vm11 = vcmp.eq.s32.totalorder %v217_v36, %v815_v40  ;;  %vm252_vm12 = vcmp.eq.s32.totalorder %v218_v37, %v815_v40  ;;  %v645_v43 = vsel %vm249_vm9, 1.0, %v783_v42  ;;  %v647_v44 = vsel %vm251_vm10, 1.0, %v783_v42 }
  0x16   :  { %v646_v46 = vsel %vm250_vm11, 1.0, %v783_v42  ;;  %v648_v47 = vsel %vm252_vm12, 1.0, %v783_v42  ;;  %vm246_vm15 = vcmp.eq.s32.totalorder %v215_v48, %v815_v40  ;;  %v641_v60 = vsel %vm245_vm14, 1.0, %v783_v42 }
  0x17   :  { %78 = vmatmul.f32.vlgmr.msra.gmra.mxu0 %v61_v9  ;;  %v331_v49 = vpack.c.bf16 %v646_v46, %v645_v43  ;;  %v332_v50 = vpack.c.bf16 %v648_v47, %v647_v44  ;;  %v642_v61 = vsel %vm246_vm15, 1.0, %v783_v42  ;;  %v643_v63 = vsel %vm247_vm0, 1.0, %v783_v42 }
  0x18   :  { %615 = vmatpush.msk.msrb.mxu0 %vm58_vm1, %v782_v8  ;;  %vm248_vm1 = vcmp.eq.s32.totalorder %v216_v51, %v815_v40  ;;  %v329_v1 = vpack.c.bf16 %v642_v61, %v641_v60  ;;  %v211_v9 = vadd.s32 64, %v806_v6  ;;  %vm243_vm7 = vcmp.eq.s32.totalorder %v214_v5, %v811_v38 }
  0x19   :  { %v378_v53 = vunpack.c.l.b16 %v331_v49  ;;  %v380_v54 = vunpack.c.l.b16 %v332_v50  ;;  %v379_v55 = vunpack.c.h.b16 %v331_v49  ;;  %v381_v58 = vunpack.c.h.b16 %v332_v50 }
  0x1a   :  { %v644_v0 = vsel %vm248_vm1, 1.0, %v783_v42  ;;  %v374_v7 = vunpack.c.l.b16 %v329_v1  ;;  %v375_v8 = vunpack.c.h.b16 %v329_v1  ;;  %vm244_vm8 = vcmp.eq.s32.totalorder %v214_v5, %v815_v40 }
  0x1b   :  { %v396_v57 = vpack.c.b16 %v380_v54, %v378_v53  ;;  %v397_v62 = vpack.c.b16 %v381_v58, %v379_v55  ;;  %v330_v3 = vpack.c.bf16 %v644_v0, %v643_v63  ;;  %v639_v21 = vsel %vm243_vm7, 1.0, %v783_v42 }
  0x1c   :  { %v640_v22 = vsel %vm244_vm8, 1.0, %v783_v42  ;;  %vm237_vm9 = vcmp.eq.s32.totalorder %v211_v9, %v811_v38  ;;  %vm238_vm10 = vcmp.eq.s32.totalorder %v211_v9, %v815_v40  ;;  %v210_v47 = vadd.s32 56, %v806_v6 }
  0x1d   :  { %414 = vmatpush.bf16.msra.mxu2 %v396_v57  ;;  %579 = vmatpush.bf16.xpose.msra.mxu1 %v396_v57  ;;  %v328_v24 = vpack.c.bf16 %v640_v22, %v639_v21  ;;  %v634_v33 = vsel %vm238_vm10, 1.0, %v783_v42  ;;  %vm233_vm15 = vcmp.eq.s32.totalorder %v209_v25, %v811_v38  ;;  %vm234_vm0 = vcmp.eq.s32.totalorder %v209_v25, %v815_v40 }
  0x1e   :  { %427 = vmatpush.bf16.msra.mxu3 %v397_v62  ;;  %vm235_vm1 = vcmp.eq.s32.totalorder %v210_v47, %v811_v38  ;;  %v629_v55 = vsel %vm233_vm15, 1.0, %v783_v42  ;;  %v630_v58 = vsel %vm234_vm0, 1.0, %v783_v42  ;;  %v208_v0 = vadd.s32 40, %v806_v6 }
  0x1f   :  { %v372_v29 = vunpack.c.l.b16 %v328_v24  ;;  %v373_v30 = vunpack.c.h.b16 %v328_v24  ;;  %v323_v61 = vpack.c.bf16 %v630_v58, %v629_v55  ;;  %v52_v55 = vld [vmem:[#allocation6 + $0x4] sm:$0x1]  ;;  %vm162_vm0 = vcmask 1040384  }
  0x21   :  { %v362_v1 = vunpack.c.l.b16 %v323_v61 }
  0x94   :  { %v79_v10 = vpop.f32.mrf.mxu0 }
  0x95   :  { %616 = vmatmul.msk.f32.vlgmr.msrb.gmra.mxu0 %vm82_vm2, %v79_v10  ;;  %v212_v10 = vadd.s32 72, %v806_v6 }
  0x97   :  { %vm239_vm11 = vcmp.eq.s32.totalorder %v212_v10, %v811_v38  ;;  %vm240_vm12 = vcmp.eq.s32.totalorder %v212_v10, %v815_v40 }
 0x112   :  { %v103_v11 = vpop.f32.mrf.mxu0 }
 0x113   :  { %v106_v12 = vmax.f32 %v103_v11, 1.0 }
 0x115   :  { %672 = vrcp.f32 %v106_v12  ;;  %v118_v16 = vand.u32 2147483648, %v106_v12  ;;  %v116_v18 = vand.u32 2147483647, %v106_v12  ;;  %vm112_vm4 = vweird.f32 %v106_v12 }
 0x117   :  { %v119_v20 = vor.u32 1.1754944e-38, %v118_v16  ;;  %vm117_vm6 = vcmp.eq.f32.partialorder %v116_v18, 8.507059e+37 }
 0x11b   :  { %v673_v13 = vpop.eup %672 }
 0x11c   :  { %v108_v14 = vmul.f32 %v673_v13, %v106_v12  ;;  %vm113_vm3 = vweird.f32 %v673_v13  ;;  %v376_v12 = vunpack.c.l.b16 %v330_v3 }
 0x11d   :  { %vm114_vm5 = vmor %vm112_vm4, %vm113_vm3  ;;  %vm241_vm3 = vcmp.eq.s32.totalorder %v213_v4, %v811_v38  ;;  %vm242_vm4 = vcmp.eq.s32.totalorder %v213_v4, %v815_v40 }
 0x11e   :  { %v109_v15 = vsub.f32 1.0, %v108_v14  ;;  %v394_v16 = vpack.c.b16 %v376_v12, %v374_v7  ;;  %v637_v18 = vsel %vm241_vm3, 1.0, %v783_v42 }
 0x120   :  { %v110_v17 = vmul.f32 %v673_v13, %v109_v15  ;;  %415 = vmatpush.bf16.msra.mxu2 %v394_v16  ;;  %580 = vmatpush.bf16.xpose.msra.mxu1 %v394_v16  ;;  %v205_v15 = vadd.s32 16, %v806_v6  ;;  %v206_v16 = vadd.s32 24, %v806_v6 }
 0x122   :  { %v111_v19 = vadd.f32 %v673_v13, %v110_v17  ;;  %vm225_vm7 = vcmp.eq.s32.totalorder %v205_v15, %v811_v38  ;;  %vm226_vm8 = vcmp.eq.s32.totalorder %v205_v15, %v815_v40  ;;  %vm227_vm10 = vcmp.eq.s32.totalorder %v206_v16, %v811_v38 }
 0x124   :  { %v115_v27 = vsel %vm114_vm5, %v673_v13, %v111_v19  ;;  %v377_v13 = vunpack.c.h.b16 %v330_v3  ;;  %v638_v19 = vsel %vm242_vm4, 1.0, %v783_v42 }
 0x125   :  { %v120_v28 = vsel %vm117_vm6, %v119_v20, %v115_v27  ;;  %v327_v23 = vpack.c.bf16 %v638_v19, %v637_v18 }
 0x126   :  { %v123_v31 = vrot.slane %v120_v28, 1  ;;  %v395_v17 = vpack.c.b16 %v377_v13, %v375_v8 }
 0x127   :  { %v370_v27 = vunpack.c.l.b16 %v327_v23  ;;  %v371_v28 = vunpack.c.h.b16 %v327_v23  ;;  %v621_v23 = vsel %vm225_vm7, 1.0, %v783_v42 }
 0x128   :  { %v125_v35 = vmul.f32 %v123_v31, %v103_v11  ;;  %428 = vmatpush.bf16.msra.mxu3 %v395_v17  ;;  %v633_v31 = vsel %vm237_vm9, 1.0, %v783_v42  ;;  %vm221_vm9 = vcmp.eq.s32.totalorder %v806_v6, %v811_v38 }
 0x129   :  { %v392_v36 = vpack.c.b16 %v372_v29, %v370_v27  ;;  %v393_v37 = vpack.c.b16 %v373_v30, %v371_v28  ;;  %v325_v43 = vpack.c.bf16 %v634_v33, %v633_v31  ;;  %v623_v27 = vsel %vm227_vm10, 1.0, %v783_v42 }
 0x12a   :  { %v817_v41 = vsub.f32 %v48_v34, %v125_v35  ;;  %v635_v34 = vsel %vm239_vm11, 1.0, %v783_v42  ;;  %v636_v35 = vsel %vm240_vm12, 1.0, %v783_v42  ;;  %vm228_vm11 = vcmp.eq.s32.totalorder %v206_v16, %v815_v40 }
 0x12b   :  { %v326_v44 = vpack.c.bf16 %v636_v35, %v635_v34  ;;  %416 = vmatpush.bf16.msra.mxu2 %v392_v36  ;;  %v366_v49 = vunpack.c.l.b16 %v325_v43  ;;  %v367_v51 = vunpack.c.h.b16 %v325_v43  ;;  %581 = vmatpush.bf16.xpose.msra.mxu1 %v392_v36  ;;  %vm222_vm12 = vcmp.eq.s32.totalorder %v806_v6, %v815_v40 }
 0x12c   :  { %v827_v45 = vadd.f32 %v817_v41, %v813_v39  ;;  %429 = vmatpush.bf16.msra.mxu3 %v393_v37  ;;  %v624_v29 = vsel %vm228_vm11, 1.0, %v783_v42  ;;  %v618_v36 = vsel %vm222_vm12, 1.0, %v783_v42 }
 0x12d   :  { %v368_v50 = vunpack.c.l.b16 %v326_v44  ;;  %v369_v53 = vunpack.c.h.b16 %v326_v44  ;;  %v320_v31 = vpack.c.bf16 %v624_v29, %v623_v27 }
 0x12e   :  { %vm128_vm13 = vcmp.gt.f32.partialorder %v827_v45, 0.0 }
 0x12f   :  { %v839_v52 = vsel %vm128_vm13, %v827_v45, 1.0  ;;  %v390_v54 = vpack.c.b16 %v368_v50, %v366_v49  ;;  %v391_v57 = vpack.c.b16 %v369_v53, %v367_v51  ;;  %v356_v37 = vunpack.c.l.b16 %v320_v31  ;;  %v176_v45 = vld [vmem:[#allocation3] sm:$0x7] }
 0x130   :  { %674 = vrcp.f32 %v839_v52  ;;  %v141_v56 = vand.u32 2147483648, %v839_v52  ;;  %v139_v59 = vand.u32 2147483647, %v839_v52  ;;  %vm135_vm2 = vweird.f32 %v839_v52 }
 0x131   :  { %417 = vmatpush.bf16.msra.mxu2 %v390_v54  ;;  %430 = vmatpush.bf16.msra.mxu3 %v391_v57  ;;  %v357_v43 = vunpack.c.h.b16 %v320_v31  ;;  %v53_v57 = vld [vmem:[#allocation6 + $0x5] sm:$0x1] }
 0x132   :  { %v142_v2 = vor.u32 1.1754944e-38, %v141_v56  ;;  %vm858_vm6 = vcmp.eq.f32.partialorder %v139_v59, 8.507059e+37  ;;  %v631_v59 = vsel %vm235_vm1, 1.0, %v783_v42  ;;  %vm164_vm1 = vcmask 1041408  }
 0x133   :  { %582 = vmatpush.bf16.xpose.msra.mxu1 %v390_v54 }
 0x136   :  { %v675_v11 = vpop.eup %674 }
 0x137   :  { %v131_v14 = vmul.f32 %v675_v11, %v839_v52  ;;  %vm136_vm5 = vweird.f32 %v675_v11 }
 0x138   :  { %vm137_vm14 = vmor %vm135_vm2, %vm136_vm5  ;;  %vm236_vm2 = vcmp.eq.s32.totalorder %v210_v47, %v815_v40  ;;  %vm231_vm5 = vcmp.eq.s32.totalorder %v208_v0, %v811_v38 }
 0x139   :  { %v132_v20 = vsub.f32 1.0, %v131_v14  ;;  %v632_v60 = vsel %vm236_vm2, 1.0, %v783_v42  ;;  %v627_v9 = vsel %vm231_vm5, 1.0, %v783_v42  ;;  %vm166_vm2 = vcmask 1042432  }
 0x13a   :  { %v324_v63 = vpack.c.bf16 %v632_v60, %v631_v59  ;;  %v160_v60 = vrot.slane %v53_v57, 6 }
 0x13b   :  { %v133_v26 = vmul.f32 %v675_v11, %v132_v20  ;;  %v204_v20 = vadd.s32 8, %v806_v6 }
 0x13c   :  { %v364_v4 = vunpack.c.l.b16 %v324_v63  ;;  %v365_v5 = vunpack.c.h.b16 %v324_v63 }
 0x13d   :  { %v134_v32 = vadd.f32 %v675_v11, %v133_v26  ;;  %v622_v26 = vsel %vm226_vm8, 1.0, %v783_v42  ;;  %vm224_vm15 = vcmp.eq.s32.totalorder %v204_v20, %v815_v40 }
 0x13e   :  { %v388_v10 = vpack.c.b16 %v364_v4, %v362_v1  ;;  %v319_v30 = vpack.c.bf16 %v622_v26, %v621_v23  ;;  %v620_v47 = vsel %vm224_vm15, 1.0, %v783_v42 }
 0x13f   :  { %v138_v46 = vsel %vm137_vm14, %v675_v11, %v134_v32  ;;  %vm223_vm14 = vcmp.eq.s32.totalorder %v204_v20, %v811_v38  ;;  %v617_v32 = vsel %vm221_vm9, 1.0, %v783_v42 }
 0x140   :  { %v143_v48 = vsel %vm858_vm6, %v142_v2, %v138_v46  ;;  %v363_v2 = vunpack.c.h.b16 %v323_v61  ;;  %vm232_vm6 = vcmp.eq.s32.totalorder %v208_v0, %v815_v40  ;;  %418 = vmatpush.bf16.msra.mxu2 %v388_v10  ;;  %v354_v34 = vunpack.c.l.b16 %v319_v30  ;;  %583 = vmatpush.bf16.xpose.msra.mxu1 %v388_v10 }
 0x141   :  { %v144_v52 = vmul.f32 %v143_v48, %v813_v39  ;;  %v207_v39 = vadd.s32 32, %v806_v6  ;;  %v628_v12 = vsel %vm232_vm6, 1.0, %v783_v42  ;;  %v355_v35 = vunpack.c.h.b16 %v319_v30 }
 0x142   :  { %v389_v11 = vpack.c.b16 %v365_v5, %v363_v2  ;;  %v322_v14 = vpack.c.bf16 %v628_v12, %v627_v9  ;;  %v619_v44 = vsel %vm223_vm14, 1.0, %v783_v42  ;;  %v317_v48 = vpack.c.bf16 %v618_v36, %v617_v32 }
 0x143   :  { %v145_v56 = vsub.f32 1.0, %v144_v52  ;;  %vm229_vm3 = vcmp.eq.s32.totalorder %v207_v39, %v811_v38  ;;  %vm230_vm4 = vcmp.eq.s32.totalorder %v207_v39, %v815_v40  ;;  %v384_v40 = vpack.c.b16 %v356_v37, %v354_v34 }
 0x144   :  { %v625_v7 = vsel %vm229_vm3, 1.0, %v783_v42  ;;  %v626_v8 = vsel %vm230_vm4, 1.0, %v783_v42  ;;  %431 = vmatpush.bf16.msra.mxu3 %v389_v11  ;;  %v360_v18 = vunpack.c.l.b16 %v322_v14  ;;  %v361_v21 = vunpack.c.h.b16 %v322_v14 }
 0x145   :  { %v146_v62 = vmul.f32 2.0, %v145_v56  ;;  %v321_v13 = vpack.c.bf16 %v626_v8, %v625_v7  ;;  %v385_v49 = vpack.c.b16 %v357_v43, %v355_v35  ;;  %v318_v50 = vpack.c.bf16 %v620_v47, %v619_v44 }
 0x146   :  { %v350_v6 = vunpack.c.l.b16 %v317_v48  ;;  %v351_v38 = vunpack.c.h.b16 %v317_v48  ;;  %v182_v2 = vmul.f32 %v176_v45, %v176_v45 }
 0x147   :  { %v147_v3 = vmul.f32 1.442695, %v146_v62  ;;  %v358_v17 = vunpack.c.l.b16 %v321_v13  ;;  %v359_v19 = vunpack.c.h.b16 %v321_v13  ;;  %v352_v51 = vunpack.c.l.b16 %v318_v50 }
 0x148   :  { %v353_v52 = vunpack.c.h.b16 %v318_v50 }
 0x149   :  { %676 = vpow2.f32 %v147_v3  ;;  %v386_v22 = vpack.c.b16 %v360_v18, %v358_v17  ;;  %v387_v25 = vpack.c.b16 %v361_v21, %v359_v19  ;;  %v382_v53 = vpack.c.b16 %v352_v51, %v350_v6 }
 0x14a   :  { %v383_v54 = vpack.c.b16 %v353_v52, %v351_v38  ;;  %v184_v3 = vsel %vm166_vm2, %v182_v2, 0.0 }
 0x14b   :  { %419 = vmatpush.bf16.msra.mxu2 %v386_v22  ;;  %432 = vmatpush.bf16.msra.mxu3 %v387_v25  ;;  %v185_v4 = vrot.slane %v184_v3, 4 }
 0x14c   :  { %584 = vmatpush.bf16.xpose.msra.mxu1 %v386_v22 }
 0x14d   :  { %v186_v5 = vadd.f32 %v185_v4, %v184_v3 }
 0x14f   :  { %v677_v24 = vpop.eup %676  ;;  %420 = vmatpush.bf16.msra.mxu2 %v384_v40  ;;  %433 = vmatpush.bf16.msra.mxu3 %v385_v49  ;;  %v187_v7 = vrot.slane %v186_v5, 2 }
 0x150   :  { %v149_v28 = vsub.f32 1.0, %v677_v24 }
 0x151   :  { %v188_v8 = vadd.f32 %v187_v7, %v186_v5 }
 0x152   :  { %v150_v33 = vmul.f32 3.0, %v149_v28 }
 0x153   :  { %421 = vmatpush.bf16.msra.mxu2 %v382_v53  ;;  %434 = vmatpush.bf16.msra.mxu3 %v383_v54  ;;  %v189_v9 = vrot.slane %v188_v8, 1 }
 0x154   :  { %v151_v46 = vmul.f32 1.442695, %v150_v33  ;;  %585 = vmatpush.bf16.xpose.msra.mxu1 %v384_v40 }
 0x155   :  { %v929_v10 = vadd.f32 %v189_v9, %v188_v8 }
 0x156   :  { %678 = vpow2.f32 %v151_v46 }
 0x157   :  { %680 = vrsqrt.f32 %v929_v10  ;;  %v494_v6 = vadd.f32 1.0, %v929_v10 }
 0x15c   :  { %v679_v56 = vpop.eup %678  ;;  %586 = vmatpush.bf16.xpose.msra.mxu1 %v382_v53 }
 0x15d   :  { %v153_v42 = vsel %vm128_vm13, %v679_v56, 20.085537  ;;  %vm197_vm13 = vweird.f32 %v929_v10 }
 0x15e   :  { %v154_v58 = vmul.f32 %v153_v42, %v52_v55 }
 0x160   :  { %v155_v59 = vmul.f32 %v154_v58, %v153_v42 }
 0x162   :  { %v157_v61 = vrot.slane %v155_v59, 7 }
 0x164   :  { %v163_v39 = vsel %vm162_vm0, %v817_v41, %v157_v61  ;;  %v681_v41 = vpop.eup %680 }
 0x165   :  { %v165_v62 = vsel %vm164_vm1, %v163_v39, %v160_v60  ;;  %v192_v11 = vmul.f32 %v681_v41, %v929_v10  ;;  %vm198_vm3 = vweird.f32 %v681_v41 }
 0x166   :  { %v167_v63 = vsel %vm166_vm2, %v165_v62, 0.0  ;;  %vm199_vm4 = vmor %vm197_vm13, %vm198_vm3  ;;  %vm501_vm2 = vweird.f32 %v494_v6 }
 0x167   :  { %v168_v0 = vpack.c.bf16 %v167_v63, %v167_v63  ;;  %v193_v12 = vmul.f32 %v681_v41, %v192_v11 }
 0x169   :  { %169 = vst [vmem:[#allocation2] sm:$0xf] %v168_v0  ;;  %v194_v13 = vmul.f32 0.5, %v193_v12 }
 0x16b   :  { %v195_v14 = vsub.f32 1.5, %v194_v13 }
 0x16d   :  { %v196_v15 = vmul.f32 %v681_v41, %v195_v14 }
 0x16f   :  { %v934_v16 = vsel %vm199_vm4, %v681_v41, %v196_v15 }
 0x170   :  { %v333_v1 = vld [vmem:[#allocation2] sm:$0xf]  ;;  %v938_v17 = vmul.f32 %v934_v16, %v929_v10 }
 0x171   :  { %422 = vmatmul.bf16.vlgmr.msra.gmra.mxu2 %v333_v1  ;;  %435 = vmatmul.bf16.vlgmr.msra.gmra.mxu3 %v333_v1 }
 0x172   :  { %v649_v18 = vadd.f32 -2.5, %v938_v17 }
 0x174   :  { %v941_v19 = vmul.f32 0.2, %v649_v18 }
 0x176   :  { %v462_v20 = vsub.f32 1.0, %v941_v19  ;;  %vm442_vm5 = vcmp.le.f32.partialorder %v941_v19, 0.0  ;;  %vm486_vm4 = vcmp.ge.f32.partialorder %v941_v19, 1.0 }
 0x177   :  { %v443_v22 = vsel %vm442_vm5, 1.0, %v941_v19 }
 0x178   :  { %vm945_vm6 = vcmp.le.f32.partialorder %v462_v20, 0.0  ;;  %682 = vrcp.f32 %v443_v22  ;;  %vm449_vm7 = vweird.f32 %v443_v22  ;;  %v455_v32 = vand.u32 2147483648, %v443_v22 }
 0x179   :  { %v464_v23 = vsel %vm945_vm6, 1.0, %v462_v20  ;;  %v453_v34 = vand.u32 2147483647, %v443_v22 }
 0x17a   :  { %684 = vrcp.f32 %v464_v23  ;;  %vm470_vm9 = vweird.f32 %v464_v23  ;;  %v476_v35 = vand.u32 2147483648, %v464_v23  ;;  %v474_v37 = vand.u32 2147483647, %v464_v23 }
 0x17b   :  { %v456_v43 = vor.u32 1.1754944e-38, %v455_v32  ;;  %vm454_vm14 = vcmp.eq.f32.partialorder %v453_v34, 8.507059e+37  ;;  %686 = vrsqrt.f32 %v494_v6  ;;  %v49_v32 = vld [vmem:[#allocation6 + $0x2] sm:$0x1]  ;;  %v505_v34 = vmul.f32 0.009851853, %v938_v17 }
 0x17c   :  { %v477_v46 = vor.u32 1.1754944e-38, %v476_v35  ;;  %vm475_vm15 = vcmp.eq.f32.partialorder %v474_v37, 8.507059e+37  ;;  %175 = vst [vmem:[#allocation8] sm:$0x1] %v49_v32 }
 0x17e   :  { %v683_v24 = vpop.eup %682 }
 0x17f   :  { %v445_v26 = vmul.f32 %v683_v24, %v443_v22  ;;  %vm450_vm8 = vweird.f32 %v683_v24 }
 0x180   :  { %v685_v25 = vpop.eup %684  ;;  %vm451_vm11 = vmor %vm449_vm7, %vm450_vm8  ;;  %vm489_vm8 = vcmp.lt.f32.partialorder %v938_v17, 10.0 }
 0x181   :  { %v466_v27 = vmul.f32 %v685_v25, %v464_v23  ;;  %v446_v28 = vsub.f32 1.0, %v445_v26  ;;  %vm471_vm10 = vweird.f32 %v685_v25  ;;  %v687_v59 = vpop.eup %686  ;;  %v550_v23 = vmul.f32 %v929_v10, %v929_v10 }
 0x182   :  { %vm472_vm12 = vmor %vm470_vm9, %vm471_vm10  ;;  %v496_v0 = vmul.f32 %v687_v59, %v494_v6  ;;  %vm502_vm13 = vweird.f32 %v687_v59 }
 0x183   :  { %v467_v29 = vsub.f32 1.0, %v466_v27  ;;  %v447_v30 = vmul.f32 %v683_v24, %v446_v28  ;;  %v551_v27 = vmul.f32 %v550_v23, %v929_v10  ;;  %vm983_vm3 = vmor %vm501_vm2, %vm502_vm13 }
 0x184   :  { %v497_v7 = vmul.f32 %v687_v59, %v496_v0 }
 0x185   :  { %v468_v31 = vmul.f32 %v685_v25, %v467_v29  ;;  %v448_v33 = vadd.f32 %v683_v24, %v447_v30 }
 0x186   :  { %v498_v12 = vmul.f32 0.5, %v497_v7 }
 0x187   :  { %v469_v36 = vadd.f32 %v685_v25, %v468_v31  ;;  %v452_v44 = vsel %vm451_vm11, %v683_v24, %v448_v33  ;;  %v490_v33 = vmul.f32 0.01, %v938_v17 }
 0x188   :  { %v457_v48 = vsel %vm454_vm14, %v456_v43, %v452_v44  ;;  %v499_v21 = vsub.f32 1.5, %v498_v12  ;;  %v552_v43 = vmul.f32 %v551_v27, %v929_v10 }
 0x189   :  { %v473_v47 = vsel %vm472_vm12, %v685_v25, %v469_v36  ;;  %v458_v51 = vmul.f32 -1.0, %v457_v48  ;;  %v491_v48 = vadd.f32 %v490_v33, %v934_v16 }
 0x18a   :  { %v478_v40 = vsel %vm475_vm15, %v477_v46, %v473_v47  ;;  %v500_v26 = vmul.f32 %v687_v59, %v499_v21 }
 0x18b   :  { %v479_v53 = vmul.f32 -1.0, %v478_v40  ;;  %v459_v56 = vmul.f32 1.442695, %v458_v51 }
 0x18c   :  { %v504_v37 = vsel %vm983_vm3, %v687_v59, %v500_v26 }
 0x18d   :  { %v480_v42 = vmul.f32 1.442695, %v479_v53  ;;  %v506_v40 = vadd.f32 %v505_v34, %v504_v37 }
 0x1f4   :  { %v954_v49 = vpop.f32.mrf.mxu2  ;;  %v956_v50 = vpop.f32.mrf.mxu3 }
 0x1f5   :  { %v530_v38 = vmul.f32 3.0, %v954_v49  ;;  %v516_v52 = vmul.f32 %v956_v50, %v954_v49 }
 0x1f7   :  { %v962_v54 = vmax.f32 %v516_v52, 0.0  ;;  %v965_v55 = vmul.f32 %v530_v38, %v956_v50 }
 0x1f9   :  { %688 = vrsqrt.f32 %v962_v54  ;;  %vm543_vm0 = vcmp.eq.f32.partialorder %v965_v55, inf  ;;  %v546_v14 = vand.u32 2147483648, %v965_v55  ;;  %vm545_vm1 = vcmp.eq.f32.partialorder %v965_v55, 0.0 }
 0x1fa   :  { %690 = vrsqrt.f32 %v965_v55  ;;  %v528_v51 = vand.u32 2147483648, %v962_v54  ;;  %vm527_vm7 = vcmp.eq.f32.partialorder %v962_v54, 0.0 }
 0x1fb   :  { %692 = vpow2.f32 %v459_v56  ;;  %v650_v56 = vadd.f32 -0.2, %v491_v48 }
 0x1fc   :  { %v425_v57 = vpop.f32.mrf.mxu2  ;;  %v438_v58 = vpop.f32.mrf.mxu3  ;;  %694 = vpow2.f32 %v480_v42  ;;  %v651_v42 = vadd.f32 -0.19802225, %v506_v40 }
 0x1fd   :  { %v533_v57 = vrot.slane %v965_v55, 1 }
 0x1ff   :  { %v689_v60 = vpop.eup %688 }
 0x200   :  { %v691_v61 = vpop.eup %690  ;;  %v519_v62 = vmul.f32 %v689_v60, %v962_v54 }
 0x201   :  { %v537_v39 = vmul.f32 %v691_v61, %v965_v55  ;;  %v693_v63 = vpop.eup %692 }
 0x202   :  { %v695_v45 = vpop.eup %694  ;;  %v520_v3 = vmul.f32 %v689_v60, %v519_v62  ;;  %v461_v4 = vsel %vm442_vm5, 0.0, %v693_v63  ;;  %v509_v63 = vmul.f32 7.199823, %v954_v49  ;;  %v592_v49 = vld [vmem:[#allocation8] sm:$0x1] }
 0x203   :  { %v538_v1 = vmul.f32 %v691_v61, %v537_v39  ;;  %v482_v5 = vsel %vm945_vm6, 0.0, %v695_v45  ;;  %vm525_vm6 = vcmp.eq.f32.partialorder %v962_v54, inf }
 0x204   :  { %v483_v41 = vadd.f32 %v482_v5, %v461_v4  ;;  %v521_v11 = vmul.f32 0.5, %v520_v3  ;;  %v510_v3 = vmul.f32 %v509_v63, %v956_v50 }
 0x205   :  { %v539_v2 = vmul.f32 0.5, %v538_v1 }
 0x206   :  { %696 = vrcp.f32 %v483_v41  ;;  %v522_v18 = vsub.f32 1.5, %v521_v11  ;;  %v177_v41 = vld [vmem:[#allocation3 + $0x3] sm:$0x1] }
 0x207   :  { %v540_v8 = vsub.f32 1.5, %v539_v2 }
 0x208   :  { %v523_v25 = vmul.f32 %v689_v60, %v522_v18  ;;  %v493_v60 = vsel %vm489_vm8, %v650_v56, 0.0 }
 0x209   :  { %v541_v9 = vmul.f32 %v691_v61, %v540_v8 }
 0x20a   :  { %v524_v35 = vmul.f32 %v523_v25, %v962_v54 }
 0x20b   :  { %v542_v13 = vmul.f32 %v541_v9, %v965_v55 }
 0x20c   :  { %v697_v29 = vpop.eup %696  ;;  %v526_v6 = vsel %vm525_vm6, %v962_v54, %v524_v35  ;;  %v508_v54 = vsel %vm489_vm8, %v651_v42, 0.0 }
 0x20d   :  { %v544_v15 = vsel %vm543_vm0, %v965_v55, %v542_v13  ;;  %v485_v36 = vmul.f32 %v697_v29, %v482_v5  ;;  %v529_v10 = vsel %vm527_vm7, %v528_v51, %v526_v6 }
 0x20e   :  { %v547_v20 = vsel %vm545_vm1, %v546_v14, %v544_v15  ;;  %v535_v16 = vmul.f32 %v533_v57, %v529_v10 }
 0x20f   :  { %v548_v22 = vmul.f32 0.4, %v547_v20  ;;  %v487_v38 = vsel %vm486_vm4, 0.0, %v485_v36 }
 0x210   :  { %v488_v53 = vsel %vm442_vm5, 1.0, %v487_v38  ;;  %v563_v62 = vmul.f32 1.2, %v535_v16 }
 0x211   :  { %v549_v24 = vadd.f32 4.5, %v548_v22  ;;  %v512_v59 = vsub.f32 1.0, %v488_v53  ;;  %v511_v0 = vmul.f32 %v508_v54, %v488_v53 }
 0x213   :  { %v553_v28 = vmul.f32 %v549_v24, %v549_v24  ;;  %v513_v1 = vmul.f32 %v512_v59, %v493_v60 }
 0x215   :  { %v554_v31 = vmul.f32 %v553_v28, %v553_v28  ;;  %v514_v4 = vadd.f32 %v513_v1, %v511_v0 }
 0x217   :  { %v555_v44 = vmul.f32 %v554_v31, %v553_v28  ;;  %v515_v8 = vmul.f32 %v514_v4, %v510_v3 }
 0x219   :  { %v556_v46 = vmul.f32 %v555_v44, %v553_v28  ;;  %v557_v47 = vadd.f32 %v555_v44, %v551_v27 }
 0x21b   :  { %698 = vrcp.f32 %v557_v47  ;;  %v564_v52 = vadd.f32 %v556_v46, %v552_v43 }
 0x21d   :  { %700 = vrcp.f32 %v564_v52 }
 0x221   :  { %v699_v58 = vpop.eup %698 }
 0x222   :  { %v560_v61 = vrot.slane %v699_v58, 1 }
 0x223   :  { %v701_v39 = vpop.eup %700 }
 0x224   :  { %v567_v19 = vrot.slane %v701_v39, 1  ;;  %v562_v55 = vmul.f32 %v560_v61, %v529_v10 }
 0x226   :  { %v569_v45 = vmul.f32 %v567_v19, %v563_v62 }
 0x228   :  { %v570_v2 = vadd.f32 %v569_v45, %v562_v55 }
 0x22a   :  { %v571_v5 = vmul.f32 -0.5, %v570_v2 }
 0x22c   :  { %v572_v7 = vsel %vm489_vm8, %v571_v5, 0.0 }
 0x22d   :  { %v574_v9 = vrot.slane %v572_v7, 1 }
 0x22f   :  { %v576_v11 = vadd.f32 %v574_v9, %v515_v8 }
 0x231   :  { %v577_v12 = vmul.f32 %v576_v11, %v177_v41 }
 0x233   :  { %v578_v13 = vpack.c.bf16 %v577_v12, %v577_v12 }
 0x235   :  { %587 = vmatmul.bf16.vlgmr.msra.gmra.mxu1 %v578_v13 }
 0x2b2   :  { %v588_v50 = vpop.f32.mrf.mxu1 }
 0x2b3   :  { %v593_v14 = vadd.f32 %v592_v49, %v588_v50 }
 0x2b5   :  { %594 = vst [vmem:[#allocation8] sm:$0x1] %v593_v14 }
 0x2b6   :  { %605 = dma.vmem_to_hbm [thread:$0]  %s601_s1, 16, %s603_s21, [#allocation5]  }
 0x2ba   :  { %v590_v17 = vpop.f32.mrf.mxu1 }
 0x2bb   :  { %778 = dma.done.wait [#allocation5], 16  }
 0x2bc   :  { %779 = vsyncadd [#allocation5], 4294967280 }
 0x2bd   :  { %610 = vsyncpa [#allocation4], 1 }
 0x2be   :  { %611 = vsyncpa [#allocation7], 1 }
 0x2bf   :  { %612 = vsyncpa [#allocation5], 1 }

</bundles_post_ra>
